<compile_context>
chip_gen: v5e
topology: v5e:2x2
jax: 0.10.0
libtpu: 0.0.40
codegen_flags: <defaults>
</compile_context>

<pallas_src>
import functools
import math

import jax
import jax.numpy as jnp
import numpy as np
from jax.experimental import pallas as pl
from jax.experimental.pallas import tpu as pltpu


def _regroup_kernel(x_ref, o_ref, *, C, ps, tile_ph):
    """Lane-dense slab copies: o[r, c*ps:(c+1)*ps, :] = x[c, r*ps:(r+1)*ps, :].

    x_ref: (C, H_blk, W)       one image slab for this (batch, patch-row tile).
    o_ref: (tile_ph, C*ps, W)  regrouped rows; minor dim is the full image width.
    """
    # Static double loop: tile_ph is capped by _choose_ph_tiling so the unrolled
    # body stays small; each statement is a (ps, W) full-lane-width copy.
    for r in range(tile_ph):
        for c in range(C):
            o_ref[r, c * ps:(c + 1) * ps, :] = x_ref[c, r * ps:(r + 1) * ps, :]


def _choose_ph_tiling(C, ps, W, Hp, H, itemsize):
    """Pick how many patch rows each grid step handles.

    Returns (tile_ph, h_block, num_tiles).  In the multi-tile case tile_ph*ps is
    a multiple of 8, so the input H-block satisfies the (8, 128) layout rule; in
    the single-tile case the blocks use full array extents (always legal).
    """
    m = 8 // math.gcd(ps, 8)            # tile_ph multiple of m -> (tile_ph*ps) % 8 == 0
    row_bytes = C * ps * W * itemsize   # bytes per patch-row (input slab == output slab)
    budget = 4 * 1024 * 1024            # ~4 MiB/block; double-buffered in+out << scoped VMEM
    t = max(1, budget // max(1, row_bytes))
    t = min(t, 64)                      # bound the statically-unrolled kernel body
    t = max(m, (t // m) * m)
    if t >= Hp:
        return Hp, H, 1                 # one tile covers every patch row
    return t, t * ps, pl.cdiv(Hp, t)


def patch_extractor(x, patch_size=3):
    """Equivalent of PatchExtractor.forward.

    Returns (patches [B, Hp*Wp, C*ps*ps], (H // ps, W // ps)) with the exact
    nn.Unfold(ps, stride=ps).transpose(1, 2) ordering: patches row-major over
    (ph, pw), features ordered (c, kh, kw).
    """
    B, C, H, W = x.shape
    ps = patch_size
    Hp, Wp = H // ps, W // ps
    itemsize = jnp.dtype(x.dtype).itemsize

    tile_ph, h_block, num_t = _choose_ph_tiling(C, ps, W, Hp, H, itemsize)

    kernel = functools.partial(_regroup_kernel, C=C, ps=ps, tile_ph=tile_ph)

    inter = pl.pallas_call(
        kernel,
        out_shape=jax.ShapeDtypeStruct((B, Hp, C * ps, W), x.dtype),
        grid_spec=pltpu.PrefetchScalarGridSpec(
            num_scalar_prefetch=0,
            grid=(B, num_t),
            in_specs=[
                # (C, h_block, W): minor dim is the full W (lane-dense loads);
                # second-minor h_block is a multiple of 8 (multi-tile) or == H
                # (single tile), so the (8, 128) rule holds.
                pl.BlockSpec((None, C, h_block, W), lambda b, t: (b, 0, t, 0)),
            ],
            # (tile_ph, C*ps, W): last two dims equal the full array dims, so
            # writeback rows are lane-dense; the Hp axis is tiled for pipelining.
            out_specs=pl.BlockSpec((None, tile_ph, C * ps, W),
                                   lambda b, t: (b, t, 0, 0)),
        ),
        compiler_params=pltpu.CompilerParams(
            # Both grid axes are independent -> megacore (v7x) can shard either.
            dimension_semantics=("parallel", "parallel"),
        ),
        cost_estimate=pl.CostEstimate(
            flops=0,
            transcendentals=0,
            bytes_accessed=(B * C * H * W + B * Hp * C * ps * W) * itemsize,
        ),
    )(x)

    # Final (c, kh, kw) feature ordering + (pw, kw) interleave on the lane-dense
    # intermediate: pure layout plumbing done by XLA in the wrapper.
    inter = inter[:, :, :, : Wp * ps]                       # floor-crop width
    patches = inter.reshape(B, Hp, C, ps, Wp, ps)
    patches = jnp.transpose(patches, (0, 1, 4, 2, 3, 5)).reshape(
        B, Hp * Wp, C * ps * ps)
    return patches, (Hp, Wp)


def patch_extractor_ref(x, ps=3):
    """Pure-JAX reference reproducing torch.nn.Unfold(ps, stride=ps) + transpose(1,2)."""
    B, C, H, W = x.shape
    Hp, Wp = H // ps, W // ps
    xc = x[:, :, :Hp * ps, :Wp * ps].reshape(B, C, Hp, ps, Wp, ps)
    p = jnp.transpose(xc, (0, 2, 4, 1, 3, 5)).reshape(B, Hp * Wp, C * ps * ps)
    return p, (Hp, Wp)


if __name__ == "__main__":
    key = jax.random.PRNGKey(0)
    # B=2, C=4, H=W=16, patch_size=3 -> 5x5 = 25 patches, feature dim 4*3*3 = 36.
    x = jax.random.normal(key, (2, 4, 16, 16), dtype=jnp.float32)

    patches, spatial = patch_extractor(x, patch_size=3)
    patches = jax.block_until_ready(patches)

    ref, ref_spatial = patch_extractor_ref(x, 3)
    assert spatial == ref_spatial, (spatial, ref_spatial)
    np.testing.assert_allclose(np.asarray(patches), np.asarray(ref), rtol=0, atol=0)

    print("KERNEL_OK")
</pallas_src>

<mosaic_0001>
module attributes {stable_mosaic.version = 11 : i64} {
  func.func @_regroup_kernel(%arg0: i32, %arg1: i32, %arg2: memref<1x4x16x16xf32, #tpu.memory_space<vmem>>, %arg3: memref<1x5x12x16xf32, #tpu.memory_space<vmem>>) attributes {dimension_semantics = [#tpu.dimension_semantics<parallel>, #tpu.dimension_semantics<parallel>], iteration_bounds = array<i64: 2, 1>, scalar_prefetch = 0 : i64, scratch_operands = 0 : i64, tpu.core_type = #tpu.core_type<tc>, window_params = [{transform_indices = @transform_0, window_bounds = array<i64: 1, 4, 16, 16>}, {transform_indices = @transform_1, window_bounds = array<i64: 1, 5, 12, 16>}]} {
    %c0 = arith.constant 0 : index
    %c0_0 = arith.constant 0 : index
    %c0_1 = arith.constant 0 : index
    %c0_2 = arith.constant 0 : index
    %0 = vector.load %arg2[%c0, %c0_0, %c0_1, %c0_2] : memref<1x4x16x16xf32, #tpu.memory_space<vmem>>, vector<1x1x3x16xf32>
    %1 = vector.shape_cast %0 : vector<1x1x3x16xf32> to vector<3x16xf32>
    %c0_3 = arith.constant 0 : index
    %c0_4 = arith.constant 0 : index
    %c0_5 = arith.constant 0 : index
    %c0_6 = arith.constant 0 : index
    %2 = vector.load %arg3[%c0_3, %c0_4, %c0_5, %c0_6] : memref<1x5x12x16xf32, #tpu.memory_space<vmem>>, vector<1x1x3x16xf32>
    %3 = vector.shape_cast %2 : vector<1x1x3x16xf32> to vector<3x16xf32>
    %4 = vector.shape_cast %1 : vector<3x16xf32> to vector<1x1x3x16xf32>
    tpu.vector_store %arg3[%c0_3, %c0_4, %c0_5, %c0_6], %4 {strides = array<i32>} : memref<1x5x12x16xf32, #tpu.memory_space<vmem>>, vector<1x1x3x16xf32>,
    %c0_7 = arith.constant 0 : index
    %c1 = arith.constant 1 : index
    %c0_8 = arith.constant 0 : index
    %c0_9 = arith.constant 0 : index
    %5 = vector.load %arg2[%c0_7, %c1, %c0_8, %c0_9] : memref<1x4x16x16xf32, #tpu.memory_space<vmem>>, vector<1x1x3x16xf32>
    %6 = vector.shape_cast %5 : vector<1x1x3x16xf32> to vector<3x16xf32>
    %c0_10 = arith.constant 0 : index
    %c0_11 = arith.constant 0 : index
    %c3 = arith.constant 3 : index
    %c0_12 = arith.constant 0 : index
    %7 = vector.load %arg3[%c0_10, %c0_11, %c3, %c0_12] : memref<1x5x12x16xf32, #tpu.memory_space<vmem>>, vector<1x1x3x16xf32>
    %8 = vector.shape_cast %7 : vector<1x1x3x16xf32> to vector<3x16xf32>
    %9 = vector.shape_cast %6 : vector<3x16xf32> to vector<1x1x3x16xf32>
    tpu.vector_store %arg3[%c0_10, %c0_11, %c3, %c0_12], %9 {strides = array<i32>} : memref<1x5x12x16xf32, #tpu.memory_space<vmem>>, vector<1x1x3x16xf32>,
    %c0_13 = arith.constant 0 : index
    %c2 = arith.constant 2 : index
    %c0_14 = arith.constant 0 : index
    %c0_15 = arith.constant 0 : index
    %10 = vector.load %arg2[%c0_13, %c2, %c0_14, %c0_15] : memref<1x4x16x16xf32, #tpu.memory_space<vmem>>, vector<1x1x3x16xf32>
    %11 = vector.shape_cast %10 : vector<1x1x3x16xf32> to vector<3x16xf32>
    %c0_16 = arith.constant 0 : index
    %c0_17 = arith.constant 0 : index
    %c6 = arith.constant 6 : index
    %c0_18 = arith.constant 0 : index
    %12 = vector.load %arg3[%c0_16, %c0_17, %c6, %c0_18] : memref<1x5x12x16xf32, #tpu.memory_space<vmem>>, vector<1x1x3x16xf32>
    %13 = vector.shape_cast %12 : vector<1x1x3x16xf32> to vector<3x16xf32>
    %14 = vector.shape_cast %11 : vector<3x16xf32> to vector<1x1x3x16xf32>
    tpu.vector_store %arg3[%c0_16, %c0_17, %c6, %c0_18], %14 {strides = array<i32>} : memref<1x5x12x16xf32, #tpu.memory_space<vmem>>, vector<1x1x3x16xf32>,
    %c0_19 = arith.constant 0 : index
    %c3_20 = arith.constant 3 : index
    %c0_21 = arith.constant 0 : index
    %c0_22 = arith.constant 0 : index
    %15 = vector.load %arg2[%c0_19, %c3_20, %c0_21, %c0_22] : memref<1x4x16x16xf32, #tpu.memory_space<vmem>>, vector<1x1x3x16xf32>
    %16 = vector.shape_cast %15 : vector<1x1x3x16xf32> to vector<3x16xf32>
    %c0_23 = arith.constant 0 : index
    %c0_24 = arith.constant 0 : index
    %c9 = arith.constant 9 : index
    %c0_25 = arith.constant 0 : index
    %17 = vector.load %arg3[%c0_23, %c0_24, %c9, %c0_25] : memref<1x5x12x16xf32, #tpu.memory_space<vmem>>, vector<1x1x3x16xf32>
    %18 = vector.shape_cast %17 : vector<1x1x3x16xf32> to vector<3x16xf32>
    %19 = vector.shape_cast %16 : vector<3x16xf32> to vector<1x1x3x16xf32>
    tpu.vector_store %arg3[%c0_23, %c0_24, %c9, %c0_25], %19 {strides = array<i32>} : memref<1x5x12x16xf32, #tpu.memory_space<vmem>>, vector<1x1x3x16xf32>,
    %c0_26 = arith.constant 0 : index
    %c0_27 = arith.constant 0 : index
    %c3_28 = arith.constant 3 : index
    %c0_29 = arith.constant 0 : index
    %20 = vector.load %arg2[%c0_26, %c0_27, %c3_28, %c0_29] : memref<1x4x16x16xf32, #tpu.memory_space<vmem>>, vector<1x1x3x16xf32>
    %21 = vector.shape_cast %20 : vector<1x1x3x16xf32> to vector<3x16xf32>
    %c0_30 = arith.constant 0 : index
    %c1_31 = arith.constant 1 : index
    %c0_32 = arith.constant 0 : index
    %c0_33 = arith.constant 0 : index
    %22 = vector.load %arg3[%c0_30, %c1_31, %c0_32, %c0_33] : memref<1x5x12x16xf32, #tpu.memory_space<vmem>>, vector<1x1x3x16xf32>
    %23 = vector.shape_cast %22 : vector<1x1x3x16xf32> to vector<3x16xf32>
    %24 = vector.shape_cast %21 : vector<3x16xf32> to vector<1x1x3x16xf32>
    tpu.vector_store %arg3[%c0_30, %c1_31, %c0_32, %c0_33], %24 {strides = array<i32>} : memref<1x5x12x16xf32, #tpu.memory_space<vmem>>, vector<1x1x3x16xf32>,
    %c0_34 = arith.constant 0 : index
    %c1_35 = arith.constant 1 : index
    %c3_36 = arith.constant 3 : index
    %c0_37 = arith.constant 0 : index
    %25 = vector.load %arg2[%c0_34, %c1_35, %c3_36, %c0_37] : memref<1x4x16x16xf32, #tpu.memory_space<vmem>>, vector<1x1x3x16xf32>
    %26 = vector.shape_cast %25 : vector<1x1x3x16xf32> to vector<3x16xf32>
    %c0_38 = arith.constant 0 : index
    %c1_39 = arith.constant 1 : index
    %c3_40 = arith.constant 3 : index
    %c0_41 = arith.constant 0 : index
    %27 = vector.load %arg3[%c0_38, %c1_39, %c3_40, %c0_41] : memref<1x5x12x16xf32, #tpu.memory_space<vmem>>, vector<1x1x3x16xf32>
    %28 = vector.shape_cast %27 : vector<1x1x3x16xf32> to vector<3x16xf32>
    %29 = vector.shape_cast %26 : vector<3x16xf32> to vector<1x1x3x16xf32>
    tpu.vector_store %arg3[%c0_38, %c1_39, %c3_40, %c0_41], %29 {strides = array<i32>} : memref<1x5x12x16xf32, #tpu.memory_space<vmem>>, vector<1x1x3x16xf32>,
    %c0_42 = arith.constant 0 : index
    %c2_43 = arith.constant 2 : index
    %c3_44 = arith.constant 3 : index
    %c0_45 = arith.constant 0 : index
    %30 = vector.load %arg2[%c0_42, %c2_43, %c3_44, %c0_45] : memref<1x4x16x16xf32, #tpu.memory_space<vmem>>, vector<1x1x3x16xf32>
    %31 = vector.shape_cast %30 : vector<1x1x3x16xf32> to vector<3x16xf32>
    %c0_46 = arith.constant 0 : index
    %c1_47 = arith.constant 1 : index
    %c6_48 = arith.constant 6 : index
    %c0_49 = arith.constant 0 : index
    %32 = vector.load %arg3[%c0_46, %c1_47, %c6_48, %c0_49] : memref<1x5x12x16xf32, #tpu.memory_space<vmem>>, vector<1x1x3x16xf32>
    %33 = vector.shape_cast %32 : vector<1x1x3x16xf32> to vector<3x16xf32>
    %34 = vector.shape_cast %31 : vector<3x16xf32> to vector<1x1x3x16xf32>
    tpu.vector_store %arg3[%c0_46, %c1_47, %c6_48, %c0_49], %34 {strides = array<i32>} : memref<1x5x12x16xf32, #tpu.memory_space<vmem>>, vector<1x1x3x16xf32>,
    %c0_50 = arith.constant 0 : index
    %c3_51 = arith.constant 3 : index
    %c3_52 = arith.constant 3 : index
    %c0_53 = arith.constant 0 : index
    %35 = vector.load %arg2[%c0_50, %c3_51, %c3_52, %c0_53] : memref<1x4x16x16xf32, #tpu.memory_space<vmem>>, vector<1x1x3x16xf32>
    %36 = vector.shape_cast %35 : vector<1x1x3x16xf32> to vector<3x16xf32>
    %c0_54 = arith.constant 0 : index
    %c1_55 = arith.constant 1 : index
    %c9_56 = arith.constant 9 : index
    %c0_57 = arith.constant 0 : index
    %37 = vector.load %arg3[%c0_54, %c1_55, %c9_56, %c0_57] : memref<1x5x12x16xf32, #tpu.memory_space<vmem>>, vector<1x1x3x16xf32>
    %38 = vector.shape_cast %37 : vector<1x1x3x16xf32> to vector<3x16xf32>
    %39 = vector.shape_cast %36 : vector<3x16xf32> to vector<1x1x3x16xf32>
    tpu.vector_store %arg3[%c0_54, %c1_55, %c9_56, %c0_57], %39 {strides = array<i32>} : memref<1x5x12x16xf32, #tpu.memory_space<vmem>>, vector<1x1x3x16xf32>,
    %c0_58 = arith.constant 0 : index
    %c0_59 = arith.constant 0 : index
    %c6_60 = arith.constant 6 : index
    %c0_61 = arith.constant 0 : index
    %40 = vector.load %arg2[%c0_58, %c0_59, %c6_60, %c0_61] : memref<1x4x16x16xf32, #tpu.memory_space<vmem>>, vector<1x1x3x16xf32>
    %41 = vector.shape_cast %40 : vector<1x1x3x16xf32> to vector<3x16xf32>
    %c0_62 = arith.constant 0 : index
    %c2_63 = arith.constant 2 : index
    %c0_64 = arith.constant 0 : index
    %c0_65 = arith.constant 0 : index
    %42 = vector.load %arg3[%c0_62, %c2_63, %c0_64, %c0_65] : memref<1x5x12x16xf32, #tpu.memory_space<vmem>>, vector<1x1x3x16xf32>
    %43 = vector.shape_cast %42 : vector<1x1x3x16xf32> to vector<3x16xf32>
    %44 = vector.shape_cast %41 : vector<3x16xf32> to vector<1x1x3x16xf32>
    tpu.vector_store %arg3[%c0_62, %c2_63, %c0_64, %c0_65], %44 {strides = array<i32>} : memref<1x5x12x16xf32, #tpu.memory_space<vmem>>, vector<1x1x3x16xf32>,
    %c0_66 = arith.constant 0 : index
    %c1_67 = arith.constant 1 : index
    %c6_68 = arith.constant 6 : index
    %c0_69 = arith.constant 0 : index
    %45 = vector.load %arg2[%c0_66, %c1_67, %c6_68, %c0_69] : memref<1x4x16x16xf32, #tpu.memory_space<vmem>>, vector<1x1x3x16xf32>
    %46 = vector.shape_cast %45 : vector<1x1x3x16xf32> to vector<3x16xf32>
    %c0_70 = arith.constant 0 : index
    %c2_71 = arith.constant 2 : index
    %c3_72 = arith.constant 3 : index
    %c0_73 = arith.constant 0 : index
    %47 = vector.load %arg3[%c0_70, %c2_71, %c3_72, %c0_73] : memref<1x5x12x16xf32, #tpu.memory_space<vmem>>, vector<1x1x3x16xf32>
    %48 = vector.shape_cast %47 : vector<1x1x3x16xf32> to vector<3x16xf32>
    %49 = vector.shape_cast %46 : vector<3x16xf32> to vector<1x1x3x16xf32>
    tpu.vector_store %arg3[%c0_70, %c2_71, %c3_72, %c0_73], %49 {strides = array<i32>} : memref<1x5x12x16xf32, #tpu.memory_space<vmem>>, vector<1x1x3x16xf32>,
    %c0_74 = arith.constant 0 : index
    %c2_75 = arith.constant 2 : index
    %c6_76 = arith.constant 6 : index
    %c0_77 = arith.constant 0 : index
    %50 = vector.load %arg2[%c0_74, %c2_75, %c6_76, %c0_77] : memref<1x4x16x16xf32, #tpu.memory_space<vmem>>, vector<1x1x3x16xf32>
    %51 = vector.shape_cast %50 : vector<1x1x3x16xf32> to vector<3x16xf32>
    %c0_78 = arith.constant 0 : index
    %c2_79 = arith.constant 2 : index
    %c6_80 = arith.constant 6 : index
    %c0_81 = arith.constant 0 : index
    %52 = vector.load %arg3[%c0_78, %c2_79, %c6_80, %c0_81] : memref<1x5x12x16xf32, #tpu.memory_space<vmem>>, vector<1x1x3x16xf32>
    %53 = vector.shape_cast %52 : vector<1x1x3x16xf32> to vector<3x16xf32>
    %54 = vector.shape_cast %51 : vector<3x16xf32> to vector<1x1x3x16xf32>
    tpu.vector_store %arg3[%c0_78, %c2_79, %c6_80, %c0_81], %54 {strides = array<i32>} : memref<1x5x12x16xf32, #tpu.memory_space<vmem>>, vector<1x1x3x16xf32>,
    %c0_82 = arith.constant 0 : index
    %c3_83 = arith.constant 3 : index
    %c6_84 = arith.constant 6 : index
    %c0_85 = arith.constant 0 : index
    %55 = vector.load %arg2[%c0_82, %c3_83, %c6_84, %c0_85] : memref<1x4x16x16xf32, #tpu.memory_space<vmem>>, vector<1x1x3x16xf32>
    %56 = vector.shape_cast %55 : vector<1x1x3x16xf32> to vector<3x16xf32>
    %c0_86 = arith.constant 0 : index
    %c2_87 = arith.constant 2 : index
    %c9_88 = arith.constant 9 : index
    %c0_89 = arith.constant 0 : index
    %57 = vector.load %arg3[%c0_86, %c2_87, %c9_88, %c0_89] : memref<1x5x12x16xf32, #tpu.memory_space<vmem>>, vector<1x1x3x16xf32>
    %58 = vector.shape_cast %57 : vector<1x1x3x16xf32> to vector<3x16xf32>
    %59 = vector.shape_cast %56 : vector<3x16xf32> to vector<1x1x3x16xf32>
    tpu.vector_store %arg3[%c0_86, %c2_87, %c9_88, %c0_89], %59 {strides = array<i32>} : memref<1x5x12x16xf32, #tpu.memory_space<vmem>>, vector<1x1x3x16xf32>,
    %c0_90 = arith.constant 0 : index
    %c0_91 = arith.constant 0 : index
    %c9_92 = arith.constant 9 : index
    %c0_93 = arith.constant 0 : index
    %60 = vector.load %arg2[%c0_90, %c0_91, %c9_92, %c0_93] : memref<1x4x16x16xf32, #tpu.memory_space<vmem>>, vector<1x1x3x16xf32>
    %61 = vector.shape_cast %60 : vector<1x1x3x16xf32> to vector<3x16xf32>
    %c0_94 = arith.constant 0 : index
    %c3_95 = arith.constant 3 : index
    %c0_96 = arith.constant 0 : index
    %c0_97 = arith.constant 0 : index
    %62 = vector.load %arg3[%c0_94, %c3_95, %c0_96, %c0_97] : memref<1x5x12x16xf32, #tpu.memory_space<vmem>>, vector<1x1x3x16xf32>
    %63 = vector.shape_cast %62 : vector<1x1x3x16xf32> to vector<3x16xf32>
    %64 = vector.shape_cast %61 : vector<3x16xf32> to vector<1x1x3x16xf32>
    tpu.vector_store %arg3[%c0_94, %c3_95, %c0_96, %c0_97], %64 {strides = array<i32>} : memref<1x5x12x16xf32, #tpu.memory_space<vmem>>, vector<1x1x3x16xf32>,
    %c0_98 = arith.constant 0 : index
    %c1_99 = arith.constant 1 : index
    %c9_100 = arith.constant 9 : index
    %c0_101 = arith.constant 0 : index
    %65 = vector.load %arg2[%c0_98, %c1_99, %c9_100, %c0_101] : memref<1x4x16x16xf32, #tpu.memory_space<vmem>>, vector<1x1x3x16xf32>
    %66 = vector.shape_cast %65 : vector<1x1x3x16xf32> to vector<3x16xf32>
    %c0_102 = arith.constant 0 : index
    %c3_103 = arith.constant 3 : index
    %c3_104 = arith.constant 3 : index
    %c0_105 = arith.constant 0 : index
    %67 = vector.load %arg3[%c0_102, %c3_103, %c3_104, %c0_105] : memref<1x5x12x16xf32, #tpu.memory_space<vmem>>, vector<1x1x3x16xf32>
    %68 = vector.shape_cast %67 : vector<1x1x3x16xf32> to vector<3x16xf32>
    %69 = vector.shape_cast %66 : vector<3x16xf32> to vector<1x1x3x16xf32>
    tpu.vector_store %arg3[%c0_102, %c3_103, %c3_104, %c0_105], %69 {strides = array<i32>} : memref<1x5x12x16xf32, #tpu.memory_space<vmem>>, vector<1x1x3x16xf32>,
    %c0_106 = arith.constant 0 : index
    %c2_107 = arith.constant 2 : index
    %c9_108 = arith.constant 9 : index
    %c0_109 = arith.constant 0 : index
    %70 = vector.load %arg2[%c0_106, %c2_107, %c9_108, %c0_109] : memref<1x4x16x16xf32, #tpu.memory_space<vmem>>, vector<1x1x3x16xf32>
    %71 = vector.shape_cast %70 : vector<1x1x3x16xf32> to vector<3x16xf32>
    %c0_110 = arith.constant 0 : index
    %c3_111 = arith.constant 3 : index
    %c6_112 = arith.constant 6 : index
    %c0_113 = arith.constant 0 : index
    %72 = vector.load %arg3[%c0_110, %c3_111, %c6_112, %c0_113] : memref<1x5x12x16xf32, #tpu.memory_space<vmem>>, vector<1x1x3x16xf32>
    %73 = vector.shape_cast %72 : vector<1x1x3x16xf32> to vector<3x16xf32>
    %74 = vector.shape_cast %71 : vector<3x16xf32> to vector<1x1x3x16xf32>
    tpu.vector_store %arg3[%c0_110, %c3_111, %c6_112, %c0_113], %74 {strides = array<i32>} : memref<1x5x12x16xf32, #tpu.memory_space<vmem>>, vector<1x1x3x16xf32>,
    %c0_114 = arith.constant 0 : index
    %c3_115 = arith.constant 3 : index
    %c9_116 = arith.constant 9 : index
    %c0_117 = arith.constant 0 : index
    %75 = vector.load %arg2[%c0_114, %c3_115, %c9_116, %c0_117] : memref<1x4x16x16xf32, #tpu.memory_space<vmem>>, vector<1x1x3x16xf32>
    %76 = vector.shape_cast %75 : vector<1x1x3x16xf32> to vector<3x16xf32>
    %c0_118 = arith.constant 0 : index
    %c3_119 = arith.constant 3 : index
    %c9_120 = arith.constant 9 : index
    %c0_121 = arith.constant 0 : index
    %77 = vector.load %arg3[%c0_118, %c3_119, %c9_120, %c0_121] : memref<1x5x12x16xf32, #tpu.memory_space<vmem>>, vector<1x1x3x16xf32>
    %78 = vector.shape_cast %77 : vector<1x1x3x16xf32> to vector<3x16xf32>
    %79 = vector.shape_cast %76 : vector<3x16xf32> to vector<1x1x3x16xf32>
    tpu.vector_store %arg3[%c0_118, %c3_119, %c9_120, %c0_121], %79 {strides = array<i32>} : memref<1x5x12x16xf32, #tpu.memory_space<vmem>>, vector<1x1x3x16xf32>,
    %c0_122 = arith.constant 0 : index
    %c0_123 = arith.constant 0 : index
    %c12 = arith.constant 12 : index
    %c0_124 = arith.constant 0 : index
    %80 = vector.load %arg2[%c0_122, %c0_123, %c12, %c0_124] : memref<1x4x16x16xf32, #tpu.memory_space<vmem>>, vector<1x1x3x16xf32>
    %81 = vector.shape_cast %80 : vector<1x1x3x16xf32> to vector<3x16xf32>
    %c0_125 = arith.constant 0 : index
    %c4 = arith.constant 4 : index
    %c0_126 = arith.constant 0 : index
    %c0_127 = arith.constant 0 : index
    %82 = vector.load %arg3[%c0_125, %c4, %c0_126, %c0_127] : memref<1x5x12x16xf32, #tpu.memory_space<vmem>>, vector<1x1x3x16xf32>
    %83 = vector.shape_cast %82 : vector<1x1x3x16xf32> to vector<3x16xf32>
    %84 = vector.shape_cast %81 : vector<3x16xf32> to vector<1x1x3x16xf32>
    tpu.vector_store %arg3[%c0_125, %c4, %c0_126, %c0_127], %84 {strides = array<i32>} : memref<1x5x12x16xf32, #tpu.memory_space<vmem>>, vector<1x1x3x16xf32>,
    %c0_128 = arith.constant 0 : index
    %c1_129 = arith.constant 1 : index
    %c12_130 = arith.constant 12 : index
    %c0_131 = arith.constant 0 : index
    %85 = vector.load %arg2[%c0_128, %c1_129, %c12_130, %c0_131] : memref<1x4x16x16xf32, #tpu.memory_space<vmem>>, vector<1x1x3x16xf32>
    %86 = vector.shape_cast %85 : vector<1x1x3x16xf32> to vector<3x16xf32>
    %c0_132 = arith.constant 0 : index
    %c4_133 = arith.constant 4 : index
    %c3_134 = arith.constant 3 : index
    %c0_135 = arith.constant 0 : index
    %87 = vector.load %arg3[%c0_132, %c4_133, %c3_134, %c0_135] : memref<1x5x12x16xf32, #tpu.memory_space<vmem>>, vector<1x1x3x16xf32>
    %88 = vector.shape_cast %87 : vector<1x1x3x16xf32> to vector<3x16xf32>
    %89 = vector.shape_cast %86 : vector<3x16xf32> to vector<1x1x3x16xf32>
    tpu.vector_store %arg3[%c0_132, %c4_133, %c3_134, %c0_135], %89 {strides = array<i32>} : memref<1x5x12x16xf32, #tpu.memory_space<vmem>>, vector<1x1x3x16xf32>,
    %c0_136 = arith.constant 0 : index
    %c2_137 = arith.constant 2 : index
    %c12_138 = arith.constant 12 : index
    %c0_139 = arith.constant 0 : index
    %90 = vector.load %arg2[%c0_136, %c2_137, %c12_138, %c0_139] : memref<1x4x16x16xf32, #tpu.memory_space<vmem>>, vector<1x1x3x16xf32>
    %91 = vector.shape_cast %90 : vector<1x1x3x16xf32> to vector<3x16xf32>
    %c0_140 = arith.constant 0 : index
    %c4_141 = arith.constant 4 : index
    %c6_142 = arith.constant 6 : index
    %c0_143 = arith.constant 0 : index
    %92 = vector.load %arg3[%c0_140, %c4_141, %c6_142, %c0_143] : memref<1x5x12x16xf32, #tpu.memory_space<vmem>>, vector<1x1x3x16xf32>
    %93 = vector.shape_cast %92 : vector<1x1x3x16xf32> to vector<3x16xf32>
    %94 = vector.shape_cast %91 : vector<3x16xf32> to vector<1x1x3x16xf32>
    tpu.vector_store %arg3[%c0_140, %c4_141, %c6_142, %c0_143], %94 {strides = array<i32>} : memref<1x5x12x16xf32, #tpu.memory_space<vmem>>, vector<1x1x3x16xf32>,
    %c0_144 = arith.constant 0 : index
    %c3_145 = arith.constant 3 : index
    %c12_146 = arith.constant 12 : index
    %c0_147 = arith.constant 0 : index
    %95 = vector.load %arg2[%c0_144, %c3_145, %c12_146, %c0_147] : memref<1x4x16x16xf32, #tpu.memory_space<vmem>>, vector<1x1x3x16xf32>
    %96 = vector.shape_cast %95 : vector<1x1x3x16xf32> to vector<3x16xf32>
    %c0_148 = arith.constant 0 : index
    %c4_149 = arith.constant 4 : index
    %c9_150 = arith.constant 9 : index
    %c0_151 = arith.constant 0 : index
    %97 = vector.load %arg3[%c0_148, %c4_149, %c9_150, %c0_151] : memref<1x5x12x16xf32, #tpu.memory_space<vmem>>, vector<1x1x3x16xf32>
    %98 = vector.shape_cast %97 : vector<1x1x3x16xf32> to vector<3x16xf32>
    %99 = vector.shape_cast %96 : vector<3x16xf32> to vector<1x1x3x16xf32>
    tpu.vector_store %arg3[%c0_148, %c4_149, %c9_150, %c0_151], %99 {strides = array<i32>} : memref<1x5x12x16xf32, #tpu.memory_space<vmem>>, vector<1x1x3x16xf32>,
    return
  }
  func.func @transform_0(%arg0: i32, %arg1: i32) -> (i32, i32, i32, i32) {
    %c0_i32 = arith.constant 0 : i32
    %c0_i32_0 = arith.constant 0 : i32
    %c0_i32_1 = arith.constant 0 : i32
    return %arg0, %c0_i32, %arg1, %c0_i32_0 : i32, i32, i32, i32
  }
  func.func @transform_1(%arg0: i32, %arg1: i32) -> (i32, i32, i32, i32) {
    %c0_i32 = arith.constant 0 : i32
    %c0_i32_0 = arith.constant 0 : i32
    %c0_i32_1 = arith.constant 0 : i32
    return %arg0, %arg1, %c0_i32, %c0_i32_0 : i32, i32, i32, i32
  }
}

</mosaic_0001>

<bundles_post_ra>
// kernel: tpu_custom_call.1
= control target key start
LH: loop header
LB: loop body
LE: loop exit
PB: predicated region body
PF: predicated region fallthrough
CT: control target
= control target key end

     0   :  { %6 = vsyncpa [#allocation3], 0  ;;  %s666_s0 = inlined_call_operand.hbm [shape: f32[2,4,16,16], index: 0, kind: input, shape index: {}]   ;;  %s667_s1 = inlined_call_operand.vmem [shape: f32[2,5,12,16], index: 1, kind: output, shape index: {}]  }
   0x1   :  { %8 = vsyncpa [#allocation3 + $0x1], 0  ;;  %s514_s6 = smov 0   ;;  %s516_s7 = smov 0  }
   0x2   :  { %s518_s8 = smov 0   ;;  %s520_s9 = smov 0  }
   0x3   :  { %s522_s10 = smov 0   ;;  %s524_s11 = smov 0  }
   0x4 LB: > { %s318_s12 = sadd.s32 4294967295, %s500_s11   ;;  %s26_s13 = sadd.s32 1, %s496_s10  ;;  %s500_s11 = sphi %s524_s11, %s14_s11   ;;  %s496_s10 = sphi %s522_s10, %s674_s10   ;;  %s492_s9 = sphi %s520_s9, %s673_s9   ;;  %s488_s8 = sphi %s518_s8, %s672_s8   ;;  %s484_s7 = sphi %s516_s7, %s671_s7   ;;  %s480_s6 = sphi %s514_s6, %s670_s6  }
   0x5   : > { %p28_p0 = scmp.ge.s32.totalorder %s26_s13, 2  ;;  %s35_s14 = sadd.s32 1, %s488_s8 }
   0x6   : > { %p42_p1 = scmp.ne.s32.totalorder %s488_s8, %s484_s7  ;;  %p43_p2 = scmp.eq.s32.totalorder %s500_s11, 0 }
   0x7   : > { %s676_s13 = smov (%p28_p0, %s26_s13), 0  ;;  %p48_p4 = scmp.ne.s32.totalorder %s484_s7, %s480_s6 }
   0x8   : > { %p550_p3 = por %p43_p2, %p42_p1  ;;  %s30_s16 = ssub.s32 %s496_s10, %s676_s13 }
   0x9   : > { %p49_p5 = scmp.eq.s32.totalorder %s318_s12, 0  ;;  %p33_p6 = scmp.eq.s32.totalorder %s30_s16, 0 }
   0xa   : > { %p369_p8 = scmp.lt.s32.totalorder %s500_s11, 2  ;;  %s100_s19 = sand.u32 1, %s488_s8  }
   0xb   : > { %p557_p7 = por %p49_p5, %p48_p4  ;;  %s361_s20 = sshll.u32 %s496_s10, 6 }
   0xc   : > { %s563_s18 = scalar_select %p33_p6, %s488_s8, %s35_s14  }
   0xd   : > { %s322_s21 = sshll.u32 %s100_s19, 6  ;;  %s111_s24 = scalar_lea.hbm %s666_s0, %s361_s20 }
   0xe   : > { %s112_s25 = sshll.u32 %s111_s24, 4  ;;  %s104_s26 = scalar_lea.vmem [#allocation2], %s322_s21  ;;  %s113_s25 = int_to_ptr.hbm [resolvable:$true] %s112_s25 }
   0xf   : > { %s114_s27 = sshll.u32 %s104_s26, 4  ;;  %p366_p9 = pnand %p369_p8, %p550_p3  ;;  %s115_s27 = int_to_ptr.vmem [resolvable:$true] %s114_s27 }
  0x10   : > { %p325_p10 = scmp.ge.s32.totalorder %s500_s11, 1  ;;  %p122_p11 = scmp.lt.s32.totalorder %s500_s11, 3 }
  0x11   : > { %s101_s28 = scalar_lea.sflag [#allocation3], %s100_s19  ;;  %s502_s29 = smov 128  }
  0x12   : > { %s503_s30 = smov 8   ;;  %p123_p12 = pnand %p325_p10, %p122_p11 }
  0x13   : > { %368 = dma.hbm_to_vmem [thread:$0]  (!%p366_p9), %s113_s25, 1024, %s115_s27, %s101_s28, %s502_s29, %s502_s29, %s503_s30  }
  0x14   : > { %126 = sbr.rel (%p123_p12) target bundleno = 52 (0x34), region = 24  ;;  %s128_s2 = sand.u32 (!%p123_p12), 1, %s484_s7  }
  0x15   : > { %s326_s3 = sshll.u32 (!%p123_p12), %s128_s2, 6  ;;  %s129_s4 = scalar_lea.sflag (!%p123_p12), [#allocation3], %s128_s2 }
  0x16   : > { %s575_s5 = scalar_lea.vmem (!%p123_p12), [#allocation2], %s326_s3 }
  0x19   : > { %475 = dma.done.wait (%p557_p7), %s129_s4, 1024  }
  0x1a   : > { %477 = vsyncadd (%p557_p7), %s129_s4, 4294966272  ;;  %p159_p13 = scmp.lt.s32.totalorder %s492_s9, 1  ;;  %vm170_vm0 = vcmask 124928   ;;  %v169_v0 = vld [vmem:[%s575_s5] sm:$0x7] }
  0x1b   : > { %v328_v1 = vld [vmem:[%s575_s5 + $0x10] sm:$0x7]  ;;  %v329_v2 = vld [vmem:[%s575_s5 + $0x20] sm:$0x7]  ;;  %v181_v4 = vld [vmem:[%s575_s5 + $0x3] sm:$0x7] }
  0x1c   : > { %s678_s9 = smov (!%p159_p13, %s492_s9), 1  ;;  %v330_v3 = vld [vmem:[%s575_s5 + $0x30] sm:$0x7]  ;;  %v332_v5 = vld [vmem:[%s575_s5 + $0x13] sm:$0x7] }
  0x1d   : > { %s362_s6 = smul.u32 80, %s678_s9  ;;  %v334_v6 = vld [vmem:[%s575_s5 + $0x23] sm:$0x7]  ;;  %v336_v7 = vld [vmem:[%s575_s5 + $0x33] sm:$0x7] }
  0x1e   : > { %v190_v8 = vld [vmem:[%s575_s5 + $0x6] sm:$0x7]  ;;  %v339_v9 = vld [vmem:[%s575_s5 + $0x16] sm:$0x7]  ;;  %v199_v12 = vld [vmem:[%s575_s5 + $0x9] sm:$0x7] }
  0x1f   : > { %s586_s15 = scalar_lea.vmem %s667_s1, %s362_s6  ;;  %v341_v10 = vld [vmem:[%s575_s5 + $0x26] sm:$0x7]  ;;  %v343_v11 = vld [vmem:[%s575_s5 + $0x36] sm:$0x7]  ;;  %v346_v13 = vld [vmem:[%s575_s5 + $0x19] sm:$0x7] }
  0x20   : > { %171 = vst.msk [vmem:[%s586_s15] sm:$0x7] %vm170_vm0, %v169_v0  ;;  %v348_v14 = vld [vmem:[%s575_s5 + $0x29] sm:$0x7]  ;;  %v350_v15 = vld [vmem:[%s575_s5 + $0x39] sm:$0x7] }
  0x21   : > { %174 = vst.msk [vmem:[%s586_s15 + $0x3] sm:$0x7] %vm170_vm0, %v328_v1  ;;  %v208_v16 = vld [vmem:[%s575_s5 + $0xc] sm:$0x7]  ;;  %v353_v17 = vld [vmem:[%s575_s5 + $0x1c] sm:$0x7] }
  0x22   : > { %177 = vst.msk [vmem:[%s586_s15 + $0x6] sm:$0x7] %vm170_vm0, %v329_v2  ;;  %v355_v18 = vld [vmem:[%s575_s5 + $0x2c] sm:$0x7]  ;;  %v357_v19 = vld [vmem:[%s575_s5 + $0x3c] sm:$0x7] }
  0x23   : > { %180 = vst.msk [vmem:[%s586_s15 + $0x9] sm:$0x7] %vm170_vm0, %v330_v3 }
  0x24   : > { %331 = vst.msk [vmem:[%s586_s15 + $0x10] sm:$0x7] %vm170_vm0, %v181_v4 }
  0x25   : > { %333 = vst.msk [vmem:[%s586_s15 + $0x13] sm:$0x7] %vm170_vm0, %v332_v5 }
  0x26   : > { %335 = vst.msk [vmem:[%s586_s15 + $0x16] sm:$0x7] %vm170_vm0, %v334_v6 }
  0x27   : > { %337 = vst.msk [vmem:[%s586_s15 + $0x19] sm:$0x7] %vm170_vm0, %v336_v7 }
  0x28   : > { %338 = vst.msk [vmem:[%s586_s15 + $0x20] sm:$0x7] %vm170_vm0, %v190_v8 }
  0x29   : > { %340 = vst.msk [vmem:[%s586_s15 + $0x23] sm:$0x7] %vm170_vm0, %v339_v9 }
  0x2a   : > { %342 = vst.msk [vmem:[%s586_s15 + $0x26] sm:$0x7] %vm170_vm0, %v341_v10 }
  0x2b   : > { %344 = vst.msk [vmem:[%s586_s15 + $0x29] sm:$0x7] %vm170_vm0, %v343_v11 }
  0x2c   : > { %345 = vst.msk [vmem:[%s586_s15 + $0x30] sm:$0x7] %vm170_vm0, %v199_v12 }
  0x2d   : > { %347 = vst.msk [vmem:[%s586_s15 + $0x33] sm:$0x7] %vm170_vm0, %v346_v13 }
  0x2e   : > { %349 = vst.msk [vmem:[%s586_s15 + $0x36] sm:$0x7] %vm170_vm0, %v348_v14 }
  0x2f   : > { %351 = vst.msk [vmem:[%s586_s15 + $0x39] sm:$0x7] %vm170_vm0, %v350_v15 }
  0x30   : > { %352 = vst.msk [vmem:[%s586_s15 + $0x40] sm:$0x7] %vm170_vm0, %v208_v16 }
  0x31   : > { %354 = vst.msk [vmem:[%s586_s15 + $0x43] sm:$0x7] %vm170_vm0, %v353_v17 }
  0x32   : > { %356 = vst.msk [vmem:[%s586_s15 + $0x46] sm:$0x7] %vm170_vm0, %v355_v18 }
  0x33   : > { %358 = vst.msk [vmem:[%s586_s15 + $0x49] sm:$0x7] %vm170_vm0, %v357_v19 }
  0x34 PF: > { %s14_s11 = sadd.s32 1, %s500_s11   ;;  %s670_s6 = smov %s484_s7 }
  0x35   : > { %p11_p0 = scmp.ge.s32.totalorder %s14_s11, 4   ;;  %s671_s7 = smov %s488_s8 }
  0x36   : > { %s672_s8 = smov %s563_s18  ;;  %s673_s9 = smov %s496_s10 }
  0x37   : > { %s674_s10 = smov %s676_s13  ;;  %13 = sbr.rel (!%p11_p0) target bundleno = 4 (0x4), region = 71 }
  0x3c   :  { %249 = vsyncpa [#allocation3], 1 }
  0x3d   :  { %251 = vsyncpa [#allocation3 + $0x1], 1 }

</bundles_post_ra>
